<compile_context>
chip_gen: v6e
topology: v6e:2x2x1
jax: 0.10.0
libtpu: 0.0.40
codegen_flags: <defaults>
</compile_context>

<pallas_src>
import math

import jax
import jax.numpy as jnp
from jax.experimental import pallas as pl
from jax.experimental.pallas import tpu as pltpu

_SQRT_2_OVER_PI = math.sqrt(2.0 / math.pi)
_MAX_FULL_LANES = 8192  # beyond this, block the lane dim in 128-multiples


def _cdiv(a, b):
    return -(-a // b)


def _round_up(a, b):
    return _cdiv(a, b) * b


def _vmem_cap_bytes():
    """Physical VMEM capacity (bytes); conservative fallback if query fails."""
    try:
        cap = int(pltpu.get_tpu_info().vmem_capacity_bytes)
        if cap > 0:
            return cap
    except Exception:
        pass
    return 64 << 20  # v7x per-TC capacity — safe lower bound for all gens


def _gelu_kernel(x_ref, o_ref):
    x = x_ref[...].astype(jnp.float32)
    c0 = jnp.float32(_SQRT_2_OVER_PI)
    c1 = jnp.float32(_SQRT_2_OVER_PI * 0.044715)
    inner = x * (c0 + c1 * (x * x))            # == sqrt(2/pi) * (x + 0.044715*x^3)
    y = jnp.float32(0.5) * x * (jnp.float32(1.0) + jnp.tanh(inner))
    o_ref[...] = y.astype(o_ref.dtype)


def _launch_2d(x2d):
    """Run the elementwise GELU kernel over a 2-D view, picking tiles per chip gen."""
    R, C = x2d.shape
    dtype = x2d.dtype
    itemsize = jnp.dtype(dtype).itemsize
    sub = {4: 8, 2: 16, 1: 32}.get(itemsize, 8)      # sublane multiple per dtype

    vmem_cap = _vmem_cap_bytes()
    tile_target = (8 << 20) if vmem_cap >= (96 << 20) else (4 << 20)

    # Lane (minor) dim: full extent is always a legal block dim; block in
    # 128-multiples only when it is huge (ragged tail handled by the grid).
    tc = C if C <= _MAX_FULL_LANES else _MAX_FULL_LANES

    # Sublane (major) dim.
    if R <= sub:
        tr = R                                       # block dim == full array dim
        row_blocks = 1
    else:
        rows_per_tile = max(sub, ((tile_target // max(1, tc * itemsize)) // sub) * sub)
        nblk = _cdiv(R, rows_per_tile)
        if nblk < 2 and R * C * itemsize > (1 << 20):
            nblk = 2                                 # keep both v7x TCs streaming
        tr = _round_up(_cdiv(R, nblk), sub)
        row_blocks = _cdiv(R, tr)

    grid = (row_blocks, _cdiv(C, tc))
    vmem_limit = (vmem_cap * 3) // 4                 # 96 MiB on v5e/v6e, 48 MiB on v7x
    n = R * C

    return pl.pallas_call(
        _gelu_kernel,
        out_shape=jax.ShapeDtypeStruct((R, C), dtype),
        grid=grid,
        in_specs=[pl.BlockSpec((tr, tc), lambda i, j: (i, j))],
        out_specs=pl.BlockSpec((tr, tc), lambda i, j: (i, j)),
        compiler_params=pltpu.CompilerParams(
            dimension_semantics=("parallel", "parallel"),
            vmem_limit_bytes=int(vmem_limit)),
        cost_estimate=pl.CostEstimate(
            flops=int(7 * n),
            transcendentals=int(n),
            bytes_accessed=int(2 * n * itemsize)),
    )(x2d)


def gelu_pallas(x):
    """Applies tanh-approx GELU elementwise. Works on arbitrary-shaped x, zero-copy."""
    orig_shape = x.shape
    n = x.size
    if n == 0:
        return x
    flat = x.reshape(-1)

    x2d = None
    for w in (512, 256, 128):                 # lane-dense free reshape when possible
        if n % w == 0:
            x2d = flat.reshape(n // w, w)
            break
    if x2d is None:                           # natural 2-D view; still zero-copy
        c = orig_shape[-1] if x.ndim >= 2 else n
        x2d = flat.reshape(n // c, c)

    out2d = _launch_2d(x2d)
    return out2d.reshape(orig_shape)


def gelu_ref(x):
    xf = x.astype(jnp.float32)
    c = jnp.float32(_SQRT_2_OVER_PI)
    return (0.5 * xf * (1.0 + jnp.tanh(c * (xf + 0.044715 * xf**3)))).astype(x.dtype)


if __name__ == "__main__":
    key = jax.random.PRNGKey(0)
    k1, k2, k3, k4 = jax.random.split(key, 4)

    # Typical small activation tensor for this GELU: batch=2, seq=8, hidden=32.
    x = jax.random.normal(k1, (2, 8, 32), dtype=jnp.float32) * 3.0
    y = jax.block_until_ready(gelu_pallas(x))
    assert y.shape == x.shape and y.dtype == x.dtype
    assert float(jnp.max(jnp.abs(y - gelu_ref(x)))) < 2e-5

    # The module's own example input: linspace(-3, 3, 100) (odd 1-D size, no padding).
    x_lin = jnp.linspace(-3.0, 3.0, 100, dtype=jnp.float32)
    y_lin = jax.block_until_ready(gelu_pallas(x_lin))
    assert float(jnp.max(jnp.abs(y_lin - gelu_ref(x_lin)))) < 2e-5

    # Last dim not a multiple of 128 -> natural (rows, 300) view, no pad/slice passes.
    x_odd = jax.random.normal(k2, (3, 40, 300), dtype=jnp.float32) * 2.0
    y_odd = jax.block_until_ready(gelu_pallas(x_odd))
    assert float(jnp.max(jnp.abs(y_odd - gelu_ref(x_odd)))) < 2e-5

    # Multi-block row grid with a ragged last block (~1.2 MiB tensor).
    x_rag = jax.random.normal(k3, (2, 300, 512), dtype=jnp.float32)
    y_rag = jax.block_until_ready(gelu_pallas(x_rag))
    assert float(jnp.max(jnp.abs(y_rag - gelu_ref(x_rag)))) < 2e-5

    # bf16 I/O (halves HBM traffic); arithmetic stays f32.
    x_bf = jax.random.normal(k4, (4, 64, 128), dtype=jnp.bfloat16)
    y_bf = jax.block_until_ready(gelu_pallas(x_bf))
    assert y_bf.dtype == jnp.bfloat16
    assert float(jnp.max(jnp.abs(y_bf.astype(jnp.float32) -
                                 gelu_ref(x_bf).astype(jnp.float32)))) < 3e-2

    print("KERNEL_OK")
</pallas_src>

<mosaic_0001>
module attributes {stable_mosaic.version = 11 : i64} {
  func.func @_gelu_kernel(%arg0: i32, %arg1: i32, %arg2: memref<1x512xf32, #tpu.memory_space<vmem>>, %arg3: memref<1x512xf32, #tpu.memory_space<vmem>>) attributes {dimension_semantics = [#tpu.dimension_semantics<parallel>, #tpu.dimension_semantics<parallel>], iteration_bounds = array<i64: 1, 1>, scalar_prefetch = 0 : i64, scratch_operands = 0 : i64, tpu.core_type = #tpu.core_type<tc>, window_params = [{transform_indices = @transform_0, window_bounds = array<i64: 1, 512>}, {transform_indices = @transform_1, window_bounds = array<i64: 1, 512>}]} {
    %c0 = arith.constant 0 : index
    %c0_0 = arith.constant 0 : index
    %0 = vector.load %arg2[%c0, %c0_0] : memref<1x512xf32, #tpu.memory_space<vmem>>, vector<1x512xf32>
    %1 = arith.mulf %0, %0 : vector<1x512xf32>
    %cst = arith.constant 0.0356774069 : f32
    %2 = vector.broadcast %cst : f32 to vector<1x512xf32>
    %3 = arith.mulf %2, %1 : vector<1x512xf32>
    %cst_1 = arith.constant 0.797884583 : f32
    %4 = vector.broadcast %cst_1 : f32 to vector<1x512xf32>
    %5 = arith.addf %4, %3 : vector<1x512xf32>
    %6 = arith.mulf %0, %5 : vector<1x512xf32>
    %cst_2 = arith.constant 5.000000e-01 : f32
    %7 = vector.broadcast %cst_2 : f32 to vector<1x512xf32>
    %8 = arith.mulf %7, %0 : vector<1x512xf32>
    %9 = math.tanh %6 : vector<1x512xf32>
    %cst_3 = arith.constant 1.000000e+00 : f32
    %10 = vector.broadcast %cst_3 : f32 to vector<1x512xf32>
    %11 = arith.addf %10, %9 : vector<1x512xf32>
    %12 = arith.mulf %8, %11 : vector<1x512xf32>
    %c0_4 = arith.constant 0 : index
    %c0_5 = arith.constant 0 : index
    %13 = vector.load %arg3[%c0_4, %c0_5] : memref<1x512xf32, #tpu.memory_space<vmem>>, vector<1x512xf32>
    tpu.vector_store %arg3[%c0_4, %c0_5], %12 {strides = array<i32>} : memref<1x512xf32, #tpu.memory_space<vmem>>, vector<1x512xf32>,
    return
  }
  func.func @transform_0(%arg0: i32, %arg1: i32) -> (i32, i32) {
    %c0_i32 = arith.constant 0 : i32
    return %arg0, %arg1 : i32, i32
  }
  func.func @transform_1(%arg0: i32, %arg1: i32) -> (i32, i32) {
    %c0_i32 = arith.constant 0 : i32
    return %arg0, %arg1 : i32, i32
  }
}

</mosaic_0001>

<bundles_post_ra>
// kernel: tpu_custom_call.1
= control target key start
LH: loop header
LB: loop body
LE: loop exit
PB: predicated region body
PF: predicated region fallthrough
CT: control target
= control target key end

     0   :  { %6 = vsyncpa [#allocation3], 0  ;;  %s116_s0 = inlined_call_operand.hbm [shape: f32[1,512], index: 0, kind: input, shape index: {}]   ;;  %s117_s1 = inlined_call_operand.hbm [shape: f32[1,512], index: 1, kind: output, shape index: {}]  }
   0x1   :  { %7 = vsyncpa [#allocation4], 0  ;;  %s98_s6 = smov [#allocation2]  }
   0x2   :  { %s14_s7 = sshll.u32 %s98_s6, 4  ;;  %s15_s7 = int_to_ptr.vmem [resolvable:$true] %s14_s7 }
   0x3   :  { %s62_s8 = scalar_lea.vmem %s15_s7, 64  ;;  %p67_p1 = scmp.lt.s32.totalorder %s15_s7, %s15_s7 }
   0x4   :  { %p63_p0 = scmp.ne.s32.totalorder %s15_s7, %s62_s8  ;;  %p68_p2 = scmp.lt.s32.totalorder %s62_s8, %s62_s8 }
   0x6   :  { %p69_p3 = por %p68_p2, %p67_p1 }
   0x8   :  { %p70_p4 = pnand %p69_p3, %p63_p0 }
   0xa   :  { %73 = shalt.err (!%p70_p4)
}
   0xb   :  { %17 = dma.hbm_to_vmem [thread:$0]  %s116_s0, 64, %s15_s7, [#allocation3]  }
   0xc   :  { %94 = dma.done.wait [#allocation3], 64  }
   0xd   :  { %95 = vsyncadd [#allocation3], 4294967232  ;;  %v21_v0 = vld [vmem:[#allocation2] sm:$0xf]  ;;  %v30_v5 = vlaneseq  ;;  %s99_s11 = smov [#allocation5]  }
   0xe   :  { %v22_v1 = vmul.f32 %v21_v0, %v21_v0  ;;  %v26_v6 = vmul.f32 0.5, %v21_v0  ;;  %s41_s12 = sshll.u32 %s99_s11, 4  ;;  %s42_s12 = int_to_ptr.vmem [resolvable:$true] %s41_s12 }
   0xf   :  { %vm32_vm0 = vcmp.lt.s32.totalorder %v30_v5, 512  ;;  %s74_s13 = scalar_lea.vmem %s42_s12, 64  ;;  %p79_p6 = scmp.lt.s32.totalorder %s42_s12, %s42_s12 }
  0x10   :  { %v23_v2 = vmul.f32 0.035677407, %v22_v1  ;;  %p75_p5 = scmp.ne.s32.totalorder %s42_s12, %s74_s13  ;;  %p80_p7 = scmp.lt.s32.totalorder %s74_s13, %s74_s13 }
  0x12   :  { %v24_v3 = vadd.f32 0.7978846, %v23_v2  ;;  %p81_p8 = por %p80_p7, %p79_p6 }
  0x14   :  { %v25_v4 = vmul.f32 %v24_v3, %v21_v0  ;;  %p82_p9 = pnand %p81_p8, %p75_p5 }
  0x16   :  { %52 = vtanh.f32 %v25_v4 }
  0x23   :  { %v53_v7 = vpop.eup %52 }
  0x24   :  { %v28_v8 = vadd.f32 1.0, %v53_v7 }
  0x26   :  { %v29_v9 = vmul.f32 %v28_v8, %v26_v6 }
  0x28   :  { %34 = vst.msk [vmem:[#allocation5] sm:$0xf] %vm32_vm0, %v29_v9 }
  0x29   :  { %85 = shalt.err (!%p82_p9)
}
  0x2a   :  { %44 = dma.vmem_to_hbm [thread:$0]  %s42_s12, 64, %s117_s1, [#allocation4]  }
  0x2b   :  { %96 = dma.done.wait [#allocation4], 64  }
  0x2c   :  { %97 = vsyncadd [#allocation4], 4294967232 }
  0x2d   :  { %48 = vsyncpa [#allocation3], 1 }
  0x2e   :  { %49 = vsyncpa [#allocation4], 1 }

</bundles_post_ra>
